<compile_context>
chip_gen: v6e
topology: v6e:2x2x1
jax: 0.10.0
libtpu: 0.0.40
codegen_flags: <defaults>
</compile_context>

<pallas_src>
import functools
import math

import jax
import jax.numpy as jnp
from jax.experimental import pallas as pl
from jax.experimental.pallas import tpu as pltpu

_LANE = 128
_SUBLANE = 8

_ACTS = {
    "relu": lambda v: jnp.maximum(v, 0.0),
    "tanh": jnp.tanh,
    "sigmoid": jax.nn.sigmoid,
    # TODO(synk): torch.nn.GELU defaults to the exact erf form; tanh-approx is
    # used here for guaranteed Mosaic lowering (difference is ~1e-3 relative).
    "gelu": lambda v: jax.nn.gelu(v, approximate=True),
}


def _round_up(n: int, m: int) -> int:
    return ((n + m - 1) // m) * m


# ----------------------------------------------------------------------------
# Kernel
# ----------------------------------------------------------------------------
def _make_mlp_kernel(num_layers: int, activation: str, output_activation):
    act_fn = _ACTS[activation]
    # Matches PyTorch MLPNARX semantics: an output_activation string that is
    # not in the activation table is silently skipped (same as the spec).
    out_act_fn = _ACTS.get(output_activation) if output_activation is not None else None

    def kernel(*refs):
        # refs = (x_ref, w0, b0, w1, b1, ..., o_ref); one batch tile per step.
        x_ref = refs[0]
        o_ref = refs[-1]
        wb = refs[1:-1]

        h = x_ref[...]
        if h.dtype != jnp.float32:          # skip no-op cast on the f32 path
            h = h.astype(jnp.float32)
        for i in range(num_layers):
            w = wb[2 * i][...]
            b = wb[2 * i + 1][...]
            h = jnp.dot(h, w, preferred_element_type=jnp.float32) + b
            if i < num_layers - 1:
                h = act_fn(h)
            elif out_act_fn is not None:
                h = out_act_fn(h)
        o_ref[...] = h.astype(o_ref.dtype)  # lane-dense (out dim padded to 128)

    return kernel


# ----------------------------------------------------------------------------
# Parameter init (PyTorch nn.Linear default: U(-1/sqrt(fan_in), 1/sqrt(fan_in)))
# Weights stored as (in_features, out_features); biases as (1, out_features).
# ----------------------------------------------------------------------------
def init_mlp_params(key, input_size, output_size, hidden_sizes):
    dims = [input_size] + list(hidden_sizes) + [output_size]
    params = []
    for i in range(len(dims) - 1):
        fan_in, fan_out = dims[i], dims[i + 1]
        key, kw, kb = jax.random.split(key, 3)
        bound = 1.0 / math.sqrt(fan_in)
        w_torch = jax.random.uniform(kw, (fan_out, fan_in), jnp.float32, -bound, bound)
        b = jax.random.uniform(kb, (fan_out,), jnp.float32, -bound, bound)
        params.append((jnp.transpose(w_torch), b.reshape(1, fan_out)))
    return params


# ----------------------------------------------------------------------------
# Wrapper
# ----------------------------------------------------------------------------
def _vmem_array_bytes(shape, itemsize=4):
    rows = _round_up(max(int(shape[0]), 1), _SUBLANE)
    cols = _round_up(int(shape[1]), _LANE)
    return rows * cols * itemsize


@functools.partial(
    jax.jit, static_argnames=("activation", "output_activation", "max_block_batch")
)
def mlp_narx_forward(x, params, activation="relu", output_activation=None,
                     max_block_batch=1024):
    if activation not in _ACTS:
        raise ValueError(f"unknown activation: {activation!r}")

    batch, in_dim = x.shape
    num_layers = len(params)
    out_dim = params[-1][0].shape[1]

    # --- lane-pad ONLY the final layer's output features (zero cols/bias) ----
    out_pad = _round_up(out_dim, _LANE)
    flat_wb = []
    for i, (w, b) in enumerate(params):
        if i == num_layers - 1 and out_pad != out_dim:
            w = jnp.pad(w, ((0, 0), (0, out_pad - out_dim)))
            b = jnp.pad(b, ((0, 0), (0, out_pad - out_dim)))
        flat_wb.extend([w, b])

    # --- pick batch tile under a VMEM budget that also fits v7x (64 MiB) -----
    weight_bytes = sum(_vmem_array_bytes(a.shape) for a in flat_wb)
    lane_dims = ([_round_up(in_dim, _LANE)]
                 + [_round_up(w.shape[1], _LANE) for w, _ in params[:-1]]
                 + [out_pad])
    widest = max(lane_dims)

    def vmem_needed(tb):
        x_blk = tb * lane_dims[0] * 4
        o_blk = tb * out_pad * 4
        inter = 2 * tb * widest * 4            # a couple of live intermediates
        return 2 * (x_blk + o_blk) + weight_bytes + inter  # 2x = double buffer

    budget = 24 * 1024 * 1024                  # conservative headroom for v7x
    tb = _round_up(min(_round_up(batch, _SUBLANE), int(max_block_batch)), _SUBLANE)
    while tb > _SUBLANE and vmem_needed(tb) > budget:
        tb = max(_SUBLANE, _round_up(tb // 2, _SUBLANE))

    # --- pad batch to a multiple of the tile (sliced back below) -------------
    batch_pad = _round_up(batch, tb)
    if batch_pad != batch:
        x = jnp.pad(x, ((0, batch_pad - batch), (0, 0)))
    grid = (batch_pad // tb,)

    # --- specs: x/out tiled over batch, weights resident across the grid -----
    in_specs = [pl.BlockSpec((tb, in_dim), lambda i: (i, 0))]
    for a in flat_wb:
        in_specs.append(pl.BlockSpec(a.shape, lambda i: (0, 0)))
    out_specs = pl.BlockSpec((tb, out_pad), lambda i: (i, 0))

    flops = 2 * batch_pad * sum(w.shape[0] * w.shape[1] for w, _ in params)
    transc = 0
    if activation in ("tanh", "sigmoid", "gelu"):
        transc += batch_pad * sum(w.shape[1] for w, _ in params[:-1])
    if output_activation in ("tanh", "sigmoid", "gelu"):
        transc += batch_pad * out_dim
    bytes_accessed = (batch_pad * in_dim * 4 + batch_pad * out_pad * 4
                      + sum(a.size * 4 for a in flat_wb))
    cost = pl.CostEstimate(flops=flops, transcendentals=transc,
                           bytes_accessed=bytes_accessed)

    vmem_limit = int(min(max(2 * vmem_needed(tb), 32 << 20), 64 << 20))
    compiler_params = pltpu.CompilerParams(
        dimension_semantics=("parallel",),     # megacore-shard batch on v7x
        vmem_limit_bytes=vmem_limit,
    )

    kernel = _make_mlp_kernel(num_layers, activation, output_activation)
    out = pl.pallas_call(
        kernel,
        out_shape=jax.ShapeDtypeStruct((batch_pad, out_pad), x.dtype),
        grid=grid,
        in_specs=in_specs,
        out_specs=out_specs,
        compiler_params=compiler_params,
        cost_estimate=cost,
    )(x, *flat_wb)

    return out[:batch, :out_dim]


# Pure-JAX reference for a sanity check.
def mlp_narx_ref(x, params, activation="relu", output_activation=None):
    h = x
    for i, (w, b) in enumerate(params):
        h = h @ w + b
        if i < len(params) - 1:
            h = _ACTS[activation](h)
        elif output_activation is not None and output_activation in _ACTS:
            h = _ACTS[output_activation](h)
    return h


# TODO(synk): dropout>0 (training-mode RNG mask) and BatchNorm1d running stats
# are not part of the default MLPNARX config and are not implemented here.

if __name__ == "__main__":
    key = jax.random.PRNGKey(0)

    # Config 1: default NARX MLP (relu hidden, no output activation), batch=8.
    batch, input_size, output_size = 8, 16, 4
    hidden_sizes = [32, 32]
    key, kx, kp = jax.random.split(key, 3)
    x = jax.random.normal(kx, (batch, input_size), jnp.float32)
    params = init_mlp_params(kp, input_size, output_size, hidden_sizes)

    out = jax.block_until_ready(mlp_narx_forward(x, params))
    ref = mlp_narx_ref(x, params)
    assert out.shape == (batch, output_size)
    assert jnp.allclose(out, ref, atol=1e-5, rtol=1e-5), "mismatch vs reference (cfg1)"

    # Config 2: non-multiple-of-tile batch, multi-step grid, gelu + tanh output.
    batch2 = 50
    key, kx2, kp2 = jax.random.split(key, 3)
    x2 = jax.random.normal(kx2, (batch2, input_size), jnp.float32)
    params2 = init_mlp_params(kp2, input_size, output_size, hidden_sizes)

    out2 = jax.block_until_ready(
        mlp_narx_forward(x2, params2, activation="gelu",
                         output_activation="tanh", max_block_batch=16))
    ref2 = mlp_narx_ref(x2, params2, activation="gelu", output_activation="tanh")
    assert out2.shape == (batch2, output_size)
    assert jnp.allclose(out2, ref2, atol=1e-5, rtol=1e-5), "mismatch vs reference (cfg2)"

    print("KERNEL_OK")
</pallas_src>

<mosaic_0001>
module attributes {stable_mosaic.version = 11 : i64} {
  func.func @kernel(%arg0: i32, %arg1: memref<8x16xf32, #tpu.memory_space<vmem>>, %arg2: memref<16x32xf32, #tpu.memory_space<vmem>>, %arg3: memref<1x32xf32, #tpu.memory_space<vmem>>, %arg4: memref<32x32xf32, #tpu.memory_space<vmem>>, %arg5: memref<1x32xf32, #tpu.memory_space<vmem>>, %arg6: memref<32x128xf32, #tpu.memory_space<vmem>>, %arg7: memref<1x128xf32, #tpu.memory_space<vmem>>, %arg8: memref<8x128xf32, #tpu.memory_space<vmem>>) attributes {dimension_semantics = [#tpu.dimension_semantics<parallel>], iteration_bounds = array<i64: 1>, scalar_prefetch = 0 : i64, scratch_operands = 0 : i64, tpu.core_type = #tpu.core_type<tc>, window_params = [{transform_indices = @transform_0, window_bounds = array<i64: 8, 16>}, {pipeline_mode = #tpu.pipeline_mode<synchronous>, transform_indices = @transform_1, window_bounds = array<i64: 16, 32>}, {pipeline_mode = #tpu.pipeline_mode<synchronous>, transform_indices = @transform_2, window_bounds = array<i64: 1, 32>}, {pipeline_mode = #tpu.pipeline_mode<synchronous>, transform_indices = @transform_3, window_bounds = array<i64: 32, 32>}, {pipeline_mode = #tpu.pipeline_mode<synchronous>, transform_indices = @transform_4, window_bounds = array<i64: 1, 32>}, {pipeline_mode = #tpu.pipeline_mode<synchronous>, transform_indices = @transform_5, window_bounds = array<i64: 32, 128>}, {pipeline_mode = #tpu.pipeline_mode<synchronous>, transform_indices = @transform_6, window_bounds = array<i64: 1, 128>}, {transform_indices = @transform_7, window_bounds = array<i64: 8, 128>}]} {
    %c0 = arith.constant 0 : index
    %c0_0 = arith.constant 0 : index
    %0 = vector.load %arg1[%c0, %c0_0] : memref<8x16xf32, #tpu.memory_space<vmem>>, vector<8x16xf32>
    %c0_1 = arith.constant 0 : index
    %c0_2 = arith.constant 0 : index
    %1 = vector.load %arg2[%c0_1, %c0_2] : memref<16x32xf32, #tpu.memory_space<vmem>>, vector<16x32xf32>
    %c0_3 = arith.constant 0 : index
    %c0_4 = arith.constant 0 : index
    %2 = vector.load %arg3[%c0_3, %c0_4] : memref<1x32xf32, #tpu.memory_space<vmem>>, vector<1x32xf32>
    %cst = arith.constant dense<0.000000e+00> : vector<8x32xf32>
    %3 = tpu.matmul %0, %1, %cst {dimension_numbers = #tpu.dot_dimension_numbers<[1], [0], [0], [1], [0, 0, 1, 1], [], []>} : vector<8x16xf32>, vector<16x32xf32>, vector<8x32xf32> -> vector<8x32xf32>
    %4 = vector.broadcast %2 : vector<1x32xf32> to vector<8x32xf32>
    %5 = arith.addf %3, %4 : vector<8x32xf32>
    %cst_5 = arith.constant 0.000000e+00 : f32
    %6 = vector.broadcast %cst_5 : f32 to vector<8x32xf32>
    %7 = arith.maximumf %5, %6 : vector<8x32xf32>
    %c0_6 = arith.constant 0 : index
    %c0_7 = arith.constant 0 : index
    %8 = vector.load %arg4[%c0_6, %c0_7] : memref<32x32xf32, #tpu.memory_space<vmem>>, vector<32x32xf32>
    %c0_8 = arith.constant 0 : index
    %c0_9 = arith.constant 0 : index
    %9 = vector.load %arg5[%c0_8, %c0_9] : memref<1x32xf32, #tpu.memory_space<vmem>>, vector<1x32xf32>
    %cst_10 = arith.constant dense<0.000000e+00> : vector<8x32xf32>
    %10 = tpu.matmul %7, %8, %cst_10 {dimension_numbers = #tpu.dot_dimension_numbers<[1], [0], [0], [1], [0, 0, 1, 1], [], []>} : vector<8x32xf32>, vector<32x32xf32>, vector<8x32xf32> -> vector<8x32xf32>
    %11 = vector.broadcast %9 : vector<1x32xf32> to vector<8x32xf32>
    %12 = arith.addf %10, %11 : vector<8x32xf32>
    %cst_11 = arith.constant 0.000000e+00 : f32
    %13 = vector.broadcast %cst_11 : f32 to vector<8x32xf32>
    %14 = arith.maximumf %12, %13 : vector<8x32xf32>
    %c0_12 = arith.constant 0 : index
    %c0_13 = arith.constant 0 : index
    %15 = vector.load %arg6[%c0_12, %c0_13] : memref<32x128xf32, #tpu.memory_space<vmem>>, vector<32x128xf32>
    %c0_14 = arith.constant 0 : index
    %c0_15 = arith.constant 0 : index
    %16 = vector.load %arg7[%c0_14, %c0_15] : memref<1x128xf32, #tpu.memory_space<vmem>>, vector<1x128xf32>
    %cst_16 = arith.constant dense<0.000000e+00> : vector<8x128xf32>
    %17 = tpu.matmul %14, %15, %cst_16 {dimension_numbers = #tpu.dot_dimension_numbers<[1], [0], [0], [1], [0, 0, 1, 1], [], []>} : vector<8x32xf32>, vector<32x128xf32>, vector<8x128xf32> -> vector<8x128xf32>
    %18 = vector.broadcast %16 : vector<1x128xf32> to vector<8x128xf32>
    %19 = arith.addf %17, %18 : vector<8x128xf32>
    %c0_17 = arith.constant 0 : index
    %c0_18 = arith.constant 0 : index
    %20 = vector.load %arg8[%c0_17, %c0_18] : memref<8x128xf32, #tpu.memory_space<vmem>>, vector<8x128xf32>
    tpu.vector_store %arg8[%c0_17, %c0_18], %19 {strides = array<i32>} : memref<8x128xf32, #tpu.memory_space<vmem>>, vector<8x128xf32>,
    return
  }
  func.func @transform_0(%arg0: i32) -> (i32, i32) {
    %c0_i32 = arith.constant 0 : i32
    %c0_i32_0 = arith.constant 0 : i32
    return %arg0, %c0_i32 : i32, i32
  }
  func.func @transform_1(%arg0: i32) -> (i32, i32) {
    %c0_i32 = arith.constant 0 : i32
    %c0_i32_0 = arith.constant 0 : i32
    %c0_i32_1 = arith.constant 0 : i32
    return %c0_i32, %c0_i32_0 : i32, i32
  }
  func.func @transform_2(%arg0: i32) -> (i32, i32) {
    %c0_i32 = arith.constant 0 : i32
    %c0_i32_0 = arith.constant 0 : i32
    %c0_i32_1 = arith.constant 0 : i32
    return %c0_i32, %c0_i32_0 : i32, i32
  }
  func.func @transform_3(%arg0: i32) -> (i32, i32) {
    %c0_i32 = arith.constant 0 : i32
    %c0_i32_0 = arith.constant 0 : i32
    %c0_i32_1 = arith.constant 0 : i32
    return %c0_i32, %c0_i32_0 : i32, i32
  }
  func.func @transform_4(%arg0: i32) -> (i32, i32) {
    %c0_i32 = arith.constant 0 : i32
    %c0_i32_0 = arith.constant 0 : i32
    %c0_i32_1 = arith.constant 0 : i32
    return %c0_i32, %c0_i32_0 : i32, i32
  }
  func.func @transform_5(%arg0: i32) -> (i32, i32) {
    %c0_i32 = arith.constant 0 : i32
    %c0_i32_0 = arith.constant 0 : i32
    %c0_i32_1 = arith.constant 0 : i32
    return %c0_i32, %c0_i32_0 : i32, i32
  }
  func.func @transform_6(%arg0: i32) -> (i32, i32) {
    %c0_i32 = arith.constant 0 : i32
    %c0_i32_0 = arith.constant 0 : i32
    %c0_i32_1 = arith.constant 0 : i32
    return %c0_i32, %c0_i32_0 : i32, i32
  }
  func.func @transform_7(%arg0: i32) -> (i32, i32) {
    %c0_i32 = arith.constant 0 : i32
    %c0_i32_0 = arith.constant 0 : i32
    return %arg0, %c0_i32 : i32, i32
  }
}

</mosaic_0001>

<bundles_post_ra>
// kernel: mlp_narx_forward.1
= control target key start
LH: loop header
LB: loop body
LE: loop exit
PB: predicated region body
PF: predicated region fallthrough
CT: control target
= control target key end

     0   :  { %v336_v0 = vmov 0.0   ;;  %vm337_vm0 = vmmov 0   ;;  %vm36_vm1 = vcmask 130048   ;;  %vm122_vm2 = vcmask 261120   ;;  %s425_s1 = inlined_call_operand.vmem [shape: f32[16,32], index: 1, kind: input, shape index: {}]   ;;  %s426_s0 = inlined_call_operand.vmem [shape: f32[8,16], index: 0, kind: input, shape index: {}]   ;;  %s427_s3 = inlined_call_operand.vmem [shape: f32[32,32], index: 3, kind: input, shape index: {}]   ;;  %s428_s5 = inlined_call_operand.vmem [shape: f32[32,128], index: 5, kind: input, shape index: {}]   ;;  %s429_s2 = inlined_call_operand.vmem [shape: f32[1,32], index: 2, kind: input, shape index: {}]   ;;  %s430_s4 = inlined_call_operand.vmem [shape: f32[1,32], index: 4, kind: input, shape index: {}]   ;;  %s431_s6 = inlined_call_operand.vmem [shape: f32[1,128], index: 6, kind: input, shape index: {}]   ;;  %s432_s7 = inlined_call_operand.vmem [shape: f32[8,128], index: 7, kind: output, shape index: {}]  }
   0x1   :  { %305 = vmatprep.subr.mxu0 %v336_v0  ;;  %v28_v1 = vld [vmem:[%s425_s1 + $0x8] sm:$0xff]  ;;  %v27_v2 = vld [vmem:[%s425_s1] sm:$0xff]  ;;  %309 = vmatprep.mubr.msk.f32.mxu0 %vm337_vm0, %v336_v0  ;;  %v114_v4 = vld [vmem:[%s427_s3 + $0x18] sm:$0xff] }
   0x2   :  { %306 = vmatpush3.msra.mxu0 %v28_v1  ;;  %v26_v3 = vld [vmem:[%s426_s0] sm:$0xff]  ;;  %312 = vmatprep.subr.mxu1 %v336_v0  ;;  %v113_v5 = vld [vmem:[%s427_s3 + $0x10] sm:$0xff]  ;;  %v112_v6 = vld [vmem:[%s427_s3 + $0x8] sm:$0xff] }
   0x3   :  { %307 = vmatprep.subr.mxu0 %v336_v0  ;;  %313 = vmatpush3.msra.mxu1 %v114_v4  ;;  %v111_v7 = vld [vmem:[%s427_s3] sm:$0xff]  ;;  %v200_v8 = vld [vmem:[%s428_s5 + $0x18] sm:$0xff]  ;;  %v199_v14 = vld [vmem:[%s428_s5 + $0x10] sm:$0xff] }
   0x4   :  { %308 = vmatpush3.msra.mxu0 %v27_v2  ;;  %314 = vmatprep.subr.mxu1 %v336_v0  ;;  %v286_v9 = vld [vmem:[%s429_s2] ss:$0 sm:$0xff]  ;;  %v198_v15 = vld [vmem:[%s428_s5 + $0x8] sm:$0xff] }
   0x5   :  { %310 = vmatmul.mubr.msk.f32.vlgmr.msra.gmra.mxu0 %vm36_vm1, %v26_v3  ;;  %320 = vmatprep.mubr.msk.f32.mxu1 %vm337_vm0, %v336_v0  ;;  %v197_v16 = vld [vmem:[%s428_s5] sm:$0xff] }
   0x6   :  { %323 = vmatprep.subr.mxu0 %v336_v0  ;;  %331 = vmatprep.mubr.msk.f32.mxu0 %vm337_vm0, %v336_v0  ;;  %v288_v17 = vld [vmem:[%s430_s4] ss:$0 sm:$0xff] }
   0x7   :  { %315 = vmatpush3.msra.mxu1 %v113_v5  ;;  %324 = vmatpush3.msra.mxu0 %v200_v8  ;;  %v290_v22 = vld [vmem:[%s431_s6] ss:$0 sm:$0xff] }
   0x8   :  { %316 = vmatprep.subr.mxu1 %v336_v0  ;;  %325 = vmatprep.subr.mxu0 %v336_v0 }
   0x9   :  { %317 = vmatpush3.msra.mxu1 %v112_v6  ;;  %326 = vmatpush3.msra.mxu0 %v199_v14 }
   0xa   :  { %318 = vmatprep.subr.mxu1 %v336_v0  ;;  %327 = vmatprep.subr.mxu0 %v336_v0 }
   0xb   :  { %319 = vmatpush3.msra.mxu1 %v111_v7  ;;  %328 = vmatpush3.msra.mxu0 %v198_v15 }
   0xc   :  { %329 = vmatprep.subr.mxu0 %v336_v0 }
   0xd   :  { %330 = vmatpush3.msra.mxu0 %v197_v16 }
  0xc5   :  { %v106_v10 = vpop.f32.mrf.mxu0 }
  0xc6   :  { %v107_v11 = vadd.f32 %v286_v9, %v106_v10 }
  0xc7   :  { %v311_v12 = vpop.f32.mrf.mxu0 }
  0xc8   :  { %v110_v13 = vmax.f32 %v107_v11, 0.0 }
  0xca   :  { %321 = vmatmul.mubr.msk.f32.vlgmr.msra.gmra.mxu1 %vm122_vm2, %v110_v13 }
 0x18a   :  { %v192_v18 = vpop.f32.mrf.mxu1 }
 0x18b   :  { %v193_v19 = vadd.f32 %v288_v17, %v192_v18 }
 0x18c   :  { %v322_v20 = vpop.f32.mrf.mxu1 }
 0x18d   :  { %v196_v21 = vmax.f32 %v193_v19, 0.0 }
 0x18f   :  { %332 = vmatmul.mubr.msk.f32.vlgmr.msra.gmra.mxu0 %vm122_vm2, %v196_v21 }
 0x24f   :  { %v277_v23 = vpop.f32.mrf.mxu0 }
 0x250   :  { %v278_v24 = vadd.f32 %v290_v22, %v277_v23 }
 0x251   :  { %v333_v25 = vpop.f32.mrf.mxu0 }
 0x252   :  { %281 = vst [vmem:[%s432_s7] sm:$0xff] %v278_v24 }

</bundles_post_ra>
